<compile_context>
chip_gen: v7x
topology: tpu7x:2x2x1
jax: 0.10.0
libtpu: 0.0.40
codegen_flags: <defaults>
</compile_context>

<pallas_src>
import functools
import math

import jax
import jax.numpy as jnp
from jax import lax
from jax.experimental import pallas as pl
from jax.experimental.pallas import tpu as pltpu


def _round_up(x, m):
    return ((x + m - 1) // m) * m


def _rnn_kernel(gcat_ref, whh_ref, o_ref, h_scr, *, t_blk):
    """One grid step = T_BLK timesteps of the fused (fwd | rev) recurrence.

    gcat_ref : (t_blk, Bp, Cp) precomputed gates; [:, :, :H] forward time order,
                               [:, :, H:2H] reverse direction already time-flipped,
                               [:, :, 2H:]  zero padding.
    whh_ref  : (Cp, Cp)        block-diag(W_hh_fwd, W_hh_rev), zero-padded.
    o_ref    : (t_blk, Bp, Cp) hidden states (kernel-step order).
    h_scr    : (Bp, Cp)        fused hidden carry, persists across the grid.
    """
    tb = pl.program_id(0)

    @pl.when(tb == 0)
    def _():
        h_scr[...] = jnp.zeros_like(h_scr)

    whh = whh_ref[...]                      # load recurrent weight once per block
    h = h_scr[...]                          # keep the carry in vregs across the unroll
    for i in range(t_blk):                  # static unroll; serial data-dep via h
        h = jnp.tanh(
            gcat_ref[i]
            + jnp.dot(h, whh, preferred_element_type=jnp.float32))
        o_ref[i] = h.astype(o_ref.dtype)
    h_scr[...] = h                          # single carry writeback per block


def h_rnn_forward(x, params, t_blk=16):
    """Bidirectional single-layer RNN forward matching torch.nn.RNN semantics.

    x: (B, S, D) float32 (batch_first=True)
    returns (output, h_n) with output: (B, S, 2H), h_n: (2, B, H)
    """
    B, S, D = x.shape
    H = params["w_ih_f"].shape[1]
    C = 2 * H

    t_blk = max(1, min(t_blk, S))
    n_blk = -(-S // t_blk)
    s_pad = n_blk * t_blk
    b_pad = _round_up(B, 8)                 # sublane alignment
    c_pad = _round_up(C, 128)               # lane alignment (unmasked stores)

    x_sbd = jnp.transpose(x, (1, 0, 2))                                   # (S, B, D)

    # --- Hoisted input projection: one big matmul for all timesteps & both dirs. ---
    w_ih = jnp.concatenate([params["w_ih_f"], params["w_ih_b"]], axis=1)  # (D, 2H)
    bias = jnp.concatenate([params["b_ih_f"] + params["b_hh_f"],
                            params["b_ih_b"] + params["b_hh_b"]])         # (2H,)
    gates = jnp.einsum("sbd,dh->sbh", x_sbd, w_ih,
                       precision=lax.Precision.HIGHEST) + bias            # (S, B, 2H)
    # Reverse direction consumes time in reverse order -> flip its gate stream.
    gcat = jnp.concatenate([gates[:, :, :H], gates[::-1, :, H:]], axis=-1)
    # Zero-pad time (trailing steps run after step S-1 and are sliced off), batch
    # (sublane alignment) and channels (lane alignment).  Zero padding is preserved
    # by the recurrence because the padded weight rows/cols are zero.
    gcat = jnp.pad(gcat, ((0, s_pad - S), (0, b_pad - B), (0, c_pad - C)))

    # --- Block-diagonal recurrent weight: one MXU op updates both directions. ---
    whh = jnp.zeros((c_pad, c_pad), jnp.float32)
    whh = whh.at[:H, :H].set(params["w_hh_f"])
    whh = whh.at[H:C, H:C].set(params["w_hh_b"])

    grid_spec = pltpu.PrefetchScalarGridSpec(
        num_scalar_prefetch=0,
        grid=(n_blk,),
        in_specs=[
            pl.BlockSpec((t_blk, b_pad, c_pad), lambda tb: (tb, 0, 0)),   # gate stream
            pl.BlockSpec((c_pad, c_pad), lambda tb: (0, 0)),              # recurrent W
        ],
        out_specs=pl.BlockSpec((t_blk, b_pad, c_pad), lambda tb: (tb, 0, 0)),
        scratch_shapes=[pltpu.VMEM((b_pad, c_pad), jnp.float32)],         # hidden carry
    )

    out_all = pl.pallas_call(
        functools.partial(_rnn_kernel, t_blk=t_blk),
        out_shape=jax.ShapeDtypeStruct((s_pad, b_pad, c_pad), jnp.float32),
        grid_spec=grid_spec,
        compiler_params=pltpu.CompilerParams(
            dimension_semantics=("arbitrary",)),     # sequential: hidden-state carry
    )(gcat, whh)

    # PyTorch layout: output[:, t, :H] = fwd hidden at t, output[:, t, H:] = bwd at t.
    of = out_all[:S, :B, :H]                 # forward hiddens, natural time order
    ob = out_all[:S, :B, H:C][::-1]          # reverse hiddens, flipped back to time order
    output = jnp.concatenate([of, ob], axis=-1).transpose(1, 0, 2)        # (B, S, 2H)
    # Final hidden of both directions is produced at kernel step S-1.
    h_n = jnp.stack([out_all[S - 1, :B, :H], out_all[S - 1, :B, H:C]], axis=0)
    return output, h_n


def _rnn_dir_ref(x, w_ih, w_hh, b, reverse):
    """Pure-JAX reference for one direction (for correctness check)."""
    B = x.shape[0]
    H = w_hh.shape[0]
    xs = jnp.transpose(x, (1, 0, 2))
    if reverse:
        xs = xs[::-1]

    def step(h, xt):
        h2 = jnp.tanh(xt @ w_ih + h @ w_hh + b)
        return h2, h2

    hT, ys = lax.scan(step, jnp.zeros((B, H), jnp.float32), xs)
    if reverse:
        ys = ys[::-1]
    return ys.transpose(1, 0, 2), hT


def init_params(key, input_size, hidden_size):
    # torch.nn.RNN init: uniform(-1/sqrt(H), 1/sqrt(H)); stored transposed so the
    # kernel computes x @ W_ih and h @ W_hh directly.
    k = 1.0 / math.sqrt(hidden_size)
    keys = jax.random.split(key, 8)
    u = lambda kk, shape: jax.random.uniform(kk, shape, jnp.float32, -k, k)
    return {
        "w_ih_f": u(keys[0], (input_size, hidden_size)),
        "w_hh_f": u(keys[1], (hidden_size, hidden_size)),
        "b_ih_f": u(keys[2], (hidden_size,)),
        "b_hh_f": u(keys[3], (hidden_size,)),
        "w_ih_b": u(keys[4], (input_size, hidden_size)),
        "w_hh_b": u(keys[5], (hidden_size, hidden_size)),
        "b_ih_b": u(keys[6], (hidden_size,)),
        "b_hh_b": u(keys[7], (hidden_size,)),
    }


if __name__ == "__main__":
    B, S, D, H = 2, 8, 16, 32
    key = jax.random.PRNGKey(0)
    kx, kp = jax.random.split(key)
    x = jax.random.normal(kx, (B, S, D), jnp.float32)
    params = init_params(kp, D, H)

    fwd = jax.jit(h_rnn_forward)
    output, h_n = jax.block_until_ready(fwd(x, params))

    # Reference check against a pure-JAX bidirectional RNN (torch.nn.RNN semantics).
    of_ref, hf_ref = _rnn_dir_ref(
        x, params["w_ih_f"], params["w_hh_f"],
        params["b_ih_f"] + params["b_hh_f"], reverse=False)
    ob_ref, hb_ref = _rnn_dir_ref(
        x, params["w_ih_b"], params["w_hh_b"],
        params["b_ih_b"] + params["b_hh_b"], reverse=True)
    out_ref = jnp.concatenate([of_ref, ob_ref], axis=-1)
    hn_ref = jnp.stack([hf_ref, hb_ref], axis=0)

    assert output.shape == (B, S, 2 * H)
    assert h_n.shape == (2, B, H)
    assert jnp.allclose(output, out_ref, atol=1e-4, rtol=1e-4)
    assert jnp.allclose(h_n, hn_ref, atol=1e-4, rtol=1e-4)

    print("KERNEL_OK")
</pallas_src>

<mosaic_0001>
module attributes {stable_mosaic.version = 11 : i64} {
  func.func @_rnn_kernel(%arg0: i32, %arg1: memref<8x8x128xf32, #tpu.memory_space<vmem>>, %arg2: memref<128x128xf32, #tpu.memory_space<vmem>>, %arg3: memref<8x8x128xf32, #tpu.memory_space<vmem>>, %arg4: memref<8x128xf32, #tpu.memory_space<vmem>>) attributes {dimension_semantics = [#tpu.dimension_semantics<arbitrary>], iteration_bounds = array<i64: 1>, scalar_prefetch = 0 : i64, scratch_operands = 1 : i64, tpu.core_type = #tpu.core_type<tc>, window_params = [{transform_indices = @transform_0, window_bounds = array<i64: 8, 8, 128>}, {pipeline_mode = #tpu.pipeline_mode<synchronous>, transform_indices = @transform_1, window_bounds = array<i64: 128, 128>}, {transform_indices = @transform_2, window_bounds = array<i64: 8, 8, 128>}]} {
    %c0_i32 = arith.constant 0 : i32
    %0 = arith.cmpi eq, %arg0, %c0_i32 : i32
    %1 = arith.extui %0 : i1 to i32
    %c0_i32_0 = arith.constant 0 : i32
    %2 = arith.cmpi ne, %1, %c0_i32_0 : i32
    scf.if %2 {
      %cst_54 = arith.constant 0.000000e+00 : f32
      %70 = vector.broadcast %cst_54 : f32 to vector<8x128xf32>
      %c0_55 = arith.constant 0 : index
      %c0_56 = arith.constant 0 : index
      %71 = vector.load %arg4[%c0_55, %c0_56] : memref<8x128xf32, #tpu.memory_space<vmem>>, vector<8x128xf32>
      tpu.vector_store %arg4[%c0_55, %c0_56], %70 {strides = array<i32>} : memref<8x128xf32, #tpu.memory_space<vmem>>, vector<8x128xf32>,
    } else {
    }
    %c0 = arith.constant 0 : index
    %c0_1 = arith.constant 0 : index
    %3 = vector.load %arg2[%c0, %c0_1] : memref<128x128xf32, #tpu.memory_space<vmem>>, vector<128x128xf32>
    %c0_2 = arith.constant 0 : index
    %c0_3 = arith.constant 0 : index
    %4 = vector.load %arg4[%c0_2, %c0_3] : memref<8x128xf32, #tpu.memory_space<vmem>>, vector<8x128xf32>
    %c0_4 = arith.constant 0 : index
    %c0_5 = arith.constant 0 : index
    %c0_6 = arith.constant 0 : index
    %5 = vector.load %arg1[%c0_4, %c0_5, %c0_6] : memref<8x8x128xf32, #tpu.memory_space<vmem>>, vector<1x8x128xf32>
    %6 = vector.shape_cast %5 : vector<1x8x128xf32> to vector<8x128xf32>
    %cst = arith.constant dense<0.000000e+00> : vector<8x128xf32>
    %7 = tpu.matmul %4, %3, %cst {dimension_numbers = #tpu.dot_dimension_numbers<[1], [0], [0], [1], [0, 0, 1, 1], [], []>} : vector<8x128xf32>, vector<128x128xf32>, vector<8x128xf32> -> vector<8x128xf32>
    %8 = arith.addf %6, %7 : vector<8x128xf32>
    %9 = math.tanh %8 : vector<8x128xf32>
    %c0_7 = arith.constant 0 : index
    %c0_8 = arith.constant 0 : index
    %c0_9 = arith.constant 0 : index
    %10 = vector.load %arg3[%c0_7, %c0_8, %c0_9] : memref<8x8x128xf32, #tpu.memory_space<vmem>>, vector<1x8x128xf32>
    %11 = vector.shape_cast %10 : vector<1x8x128xf32> to vector<8x128xf32>
    %12 = vector.shape_cast %9 : vector<8x128xf32> to vector<1x8x128xf32>
    tpu.vector_store %arg3[%c0_7, %c0_8, %c0_9], %12 {strides = array<i32>} : memref<8x8x128xf32, #tpu.memory_space<vmem>>, vector<1x8x128xf32>,
    %c1 = arith.constant 1 : index
    %c0_10 = arith.constant 0 : index
    %c0_11 = arith.constant 0 : index
    %13 = vector.load %arg1[%c1, %c0_10, %c0_11] : memref<8x8x128xf32, #tpu.memory_space<vmem>>, vector<1x8x128xf32>
    %14 = vector.shape_cast %13 : vector<1x8x128xf32> to vector<8x128xf32>
    %cst_12 = arith.constant dense<0.000000e+00> : vector<8x128xf32>
    %15 = tpu.matmul %9, %3, %cst_12 {dimension_numbers = #tpu.dot_dimension_numbers<[1], [0], [0], [1], [0, 0, 1, 1], [], []>} : vector<8x128xf32>, vector<128x128xf32>, vector<8x128xf32> -> vector<8x128xf32>
    %16 = arith.addf %14, %15 : vector<8x128xf32>
    %17 = math.tanh %16 : vector<8x128xf32>
    %c1_13 = arith.constant 1 : index
    %c0_14 = arith.constant 0 : index
    %c0_15 = arith.constant 0 : index
    %18 = vector.load %arg3[%c1_13, %c0_14, %c0_15] : memref<8x8x128xf32, #tpu.memory_space<vmem>>, vector<1x8x128xf32>
    %19 = vector.shape_cast %18 : vector<1x8x128xf32> to vector<8x128xf32>
    %20 = vector.shape_cast %17 : vector<8x128xf32> to vector<1x8x128xf32>
    tpu.vector_store %arg3[%c1_13, %c0_14, %c0_15], %20 {strides = array<i32>} : memref<8x8x128xf32, #tpu.memory_space<vmem>>, vector<1x8x128xf32>,
    %c2 = arith.constant 2 : index
    %c0_16 = arith.constant 0 : index
    %c0_17 = arith.constant 0 : index
    %21 = vector.load %arg1[%c2, %c0_16, %c0_17] : memref<8x8x128xf32, #tpu.memory_space<vmem>>, vector<1x8x128xf32>
    %22 = vector.shape_cast %21 : vector<1x8x128xf32> to vector<8x128xf32>
    %cst_18 = arith.constant dense<0.000000e+00> : vector<8x128xf32>
    %23 = tpu.matmul %17, %3, %cst_18 {dimension_numbers = #tpu.dot_dimension_numbers<[1], [0], [0], [1], [0, 0, 1, 1], [], []>} : vector<8x128xf32>, vector<128x128xf32>, vector<8x128xf32> -> vector<8x128xf32>
    %24 = arith.addf %22, %23 : vector<8x128xf32>
    %25 = math.tanh %24 : vector<8x128xf32>
    %c2_19 = arith.constant 2 : index
    %c0_20 = arith.constant 0 : index
    %c0_21 = arith.constant 0 : index
    %26 = vector.load %arg3[%c2_19, %c0_20, %c0_21] : memref<8x8x128xf32, #tpu.memory_space<vmem>>, vector<1x8x128xf32>
    %27 = vector.shape_cast %26 : vector<1x8x128xf32> to vector<8x128xf32>
    %28 = vector.shape_cast %25 : vector<8x128xf32> to vector<1x8x128xf32>
    tpu.vector_store %arg3[%c2_19, %c0_20, %c0_21], %28 {strides = array<i32>} : memref<8x8x128xf32, #tpu.memory_space<vmem>>, vector<1x8x128xf32>,
    %c3 = arith.constant 3 : index
    %c0_22 = arith.constant 0 : index
    %c0_23 = arith.constant 0 : index
    %29 = vector.load %arg1[%c3, %c0_22, %c0_23] : memref<8x8x128xf32, #tpu.memory_space<vmem>>, vector<1x8x128xf32>
    %30 = vector.shape_cast %29 : vector<1x8x128xf32> to vector<8x128xf32>
    %cst_24 = arith.constant dense<0.000000e+00> : vector<8x128xf32>
    %31 = tpu.matmul %25, %3, %cst_24 {dimension_numbers = #tpu.dot_dimension_numbers<[1], [0], [0], [1], [0, 0, 1, 1], [], []>} : vector<8x128xf32>, vector<128x128xf32>, vector<8x128xf32> -> vector<8x128xf32>
    %32 = arith.addf %30, %31 : vector<8x128xf32>
    %33 = math.tanh %32 : vector<8x128xf32>
    %c3_25 = arith.constant 3 : index
    %c0_26 = arith.constant 0 : index
    %c0_27 = arith.constant 0 : index
    %34 = vector.load %arg3[%c3_25, %c0_26, %c0_27] : memref<8x8x128xf32, #tpu.memory_space<vmem>>, vector<1x8x128xf32>
    %35 = vector.shape_cast %34 : vector<1x8x128xf32> to vector<8x128xf32>
    %36 = vector.shape_cast %33 : vector<8x128xf32> to vector<1x8x128xf32>
    tpu.vector_store %arg3[%c3_25, %c0_26, %c0_27], %36 {strides = array<i32>} : memref<8x8x128xf32, #tpu.memory_space<vmem>>, vector<1x8x128xf32>,
    %c4 = arith.constant 4 : index
    %c0_28 = arith.constant 0 : index
    %c0_29 = arith.constant 0 : index
    %37 = vector.load %arg1[%c4, %c0_28, %c0_29] : memref<8x8x128xf32, #tpu.memory_space<vmem>>, vector<1x8x128xf32>
    %38 = vector.shape_cast %37 : vector<1x8x128xf32> to vector<8x128xf32>
    %cst_30 = arith.constant dense<0.000000e+00> : vector<8x128xf32>
    %39 = tpu.matmul %33, %3, %cst_30 {dimension_numbers = #tpu.dot_dimension_numbers<[1], [0], [0], [1], [0, 0, 1, 1], [], []>} : vector<8x128xf32>, vector<128x128xf32>, vector<8x128xf32> -> vector<8x128xf32>
    %40 = arith.addf %38, %39 : vector<8x128xf32>
    %41 = math.tanh %40 : vector<8x128xf32>
    %c4_31 = arith.constant 4 : index
    %c0_32 = arith.constant 0 : index
    %c0_33 = arith.constant 0 : index
    %42 = vector.load %arg3[%c4_31, %c0_32, %c0_33] : memref<8x8x128xf32, #tpu.memory_space<vmem>>, vector<1x8x128xf32>
    %43 = vector.shape_cast %42 : vector<1x8x128xf32> to vector<8x128xf32>
    %44 = vector.shape_cast %41 : vector<8x128xf32> to vector<1x8x128xf32>
    tpu.vector_store %arg3[%c4_31, %c0_32, %c0_33], %44 {strides = array<i32>} : memref<8x8x128xf32, #tpu.memory_space<vmem>>, vector<1x8x128xf32>,
    %c5 = arith.constant 5 : index
    %c0_34 = arith.constant 0 : index
    %c0_35 = arith.constant 0 : index
    %45 = vector.load %arg1[%c5, %c0_34, %c0_35] : memref<8x8x128xf32, #tpu.memory_space<vmem>>, vector<1x8x128xf32>
    %46 = vector.shape_cast %45 : vector<1x8x128xf32> to vector<8x128xf32>
    %cst_36 = arith.constant dense<0.000000e+00> : vector<8x128xf32>
    %47 = tpu.matmul %41, %3, %cst_36 {dimension_numbers = #tpu.dot_dimension_numbers<[1], [0], [0], [1], [0, 0, 1, 1], [], []>} : vector<8x128xf32>, vector<128x128xf32>, vector<8x128xf32> -> vector<8x128xf32>
    %48 = arith.addf %46, %47 : vector<8x128xf32>
    %49 = math.tanh %48 : vector<8x128xf32>
    %c5_37 = arith.constant 5 : index
    %c0_38 = arith.constant 0 : index
    %c0_39 = arith.constant 0 : index
    %50 = vector.load %arg3[%c5_37, %c0_38, %c0_39] : memref<8x8x128xf32, #tpu.memory_space<vmem>>, vector<1x8x128xf32>
    %51 = vector.shape_cast %50 : vector<1x8x128xf32> to vector<8x128xf32>
    %52 = vector.shape_cast %49 : vector<8x128xf32> to vector<1x8x128xf32>
    tpu.vector_store %arg3[%c5_37, %c0_38, %c0_39], %52 {strides = array<i32>} : memref<8x8x128xf32, #tpu.memory_space<vmem>>, vector<1x8x128xf32>,
    %c6 = arith.constant 6 : index
    %c0_40 = arith.constant 0 : index
    %c0_41 = arith.constant 0 : index
    %53 = vector.load %arg1[%c6, %c0_40, %c0_41] : memref<8x8x128xf32, #tpu.memory_space<vmem>>, vector<1x8x128xf32>
    %54 = vector.shape_cast %53 : vector<1x8x128xf32> to vector<8x128xf32>
    %cst_42 = arith.constant dense<0.000000e+00> : vector<8x128xf32>
    %55 = tpu.matmul %49, %3, %cst_42 {dimension_numbers = #tpu.dot_dimension_numbers<[1], [0], [0], [1], [0, 0, 1, 1], [], []>} : vector<8x128xf32>, vector<128x128xf32>, vector<8x128xf32> -> vector<8x128xf32>
    %56 = arith.addf %54, %55 : vector<8x128xf32>
    %57 = math.tanh %56 : vector<8x128xf32>
    %c6_43 = arith.constant 6 : index
    %c0_44 = arith.constant 0 : index
    %c0_45 = arith.constant 0 : index
    %58 = vector.load %arg3[%c6_43, %c0_44, %c0_45] : memref<8x8x128xf32, #tpu.memory_space<vmem>>, vector<1x8x128xf32>
    %59 = vector.shape_cast %58 : vector<1x8x128xf32> to vector<8x128xf32>
    %60 = vector.shape_cast %57 : vector<8x128xf32> to vector<1x8x128xf32>
    tpu.vector_store %arg3[%c6_43, %c0_44, %c0_45], %60 {strides = array<i32>} : memref<8x8x128xf32, #tpu.memory_space<vmem>>, vector<1x8x128xf32>,
    %c7 = arith.constant 7 : index
    %c0_46 = arith.constant 0 : index
    %c0_47 = arith.constant 0 : index
    %61 = vector.load %arg1[%c7, %c0_46, %c0_47] : memref<8x8x128xf32, #tpu.memory_space<vmem>>, vector<1x8x128xf32>
    %62 = vector.shape_cast %61 : vector<1x8x128xf32> to vector<8x128xf32>
    %cst_48 = arith.constant dense<0.000000e+00> : vector<8x128xf32>
    %63 = tpu.matmul %57, %3, %cst_48 {dimension_numbers = #tpu.dot_dimension_numbers<[1], [0], [0], [1], [0, 0, 1, 1], [], []>} : vector<8x128xf32>, vector<128x128xf32>, vector<8x128xf32> -> vector<8x128xf32>
    %64 = arith.addf %62, %63 : vector<8x128xf32>
    %65 = math.tanh %64 : vector<8x128xf32>
    %c7_49 = arith.constant 7 : index
    %c0_50 = arith.constant 0 : index
    %c0_51 = arith.constant 0 : index
    %66 = vector.load %arg3[%c7_49, %c0_50, %c0_51] : memref<8x8x128xf32, #tpu.memory_space<vmem>>, vector<1x8x128xf32>
    %67 = vector.shape_cast %66 : vector<1x8x128xf32> to vector<8x128xf32>
    %68 = vector.shape_cast %65 : vector<8x128xf32> to vector<1x8x128xf32>
    tpu.vector_store %arg3[%c7_49, %c0_50, %c0_51], %68 {strides = array<i32>} : memref<8x8x128xf32, #tpu.memory_space<vmem>>, vector<1x8x128xf32>,
    %c0_52 = arith.constant 0 : index
    %c0_53 = arith.constant 0 : index
    %69 = vector.load %arg4[%c0_52, %c0_53] : memref<8x128xf32, #tpu.memory_space<vmem>>, vector<8x128xf32>
    tpu.vector_store %arg4[%c0_52, %c0_53], %65 {strides = array<i32>} : memref<8x128xf32, #tpu.memory_space<vmem>>, vector<8x128xf32>,
    return
  }
  func.func @transform_0(%arg0: i32) -> (i32, i32, i32) {
    %c0_i32 = arith.constant 0 : i32
    %c0_i32_0 = arith.constant 0 : i32
    %c0_i32_1 = arith.constant 0 : i32
    return %arg0, %c0_i32, %c0_i32_0 : i32, i32, i32
  }
  func.func @transform_1(%arg0: i32) -> (i32, i32) {
    %c0_i32 = arith.constant 0 : i32
    %c0_i32_0 = arith.constant 0 : i32
    %c0_i32_1 = arith.constant 0 : i32
    return %c0_i32, %c0_i32_0 : i32, i32
  }
  func.func @transform_2(%arg0: i32) -> (i32, i32, i32) {
    %c0_i32 = arith.constant 0 : i32
    %c0_i32_0 = arith.constant 0 : i32
    %c0_i32_1 = arith.constant 0 : i32
    return %arg0, %c0_i32, %c0_i32_0 : i32, i32, i32
  }
}

</mosaic_0001>

<bundles_post_ra>
// kernel: h_rnn_forward.1
= control target key start
LH: loop header
LB: loop body
LE: loop exit
PB: predicated region body
PF: predicated region fallthrough
CT: control target
= control target key end

     0   :  { %v1285_v0 = vmov 0.0|0.0   ;;  %vm1286_vm0 = vmmov 0   ;;  %v1287_v4 = vmov 0.0   ;;  %s1560_s1 = inlined_call_operand.vmem [shape: f32[128,128], index: 1, kind: input, shape index: {}]   ;;  %s1561_s0 = inlined_call_operand.vmem [shape: f32[8,8,128], index: 0, kind: input, shape index: {}]   ;;  %s1562_s2 = inlined_call_operand.vmem [shape: f32[8,8,128], index: 2, kind: output, shape index: {}]  }
   0x1   :  { %1074 = vmatprep.subr.bf16.mxu0 %v1285_v0  ;;  %v16_v1 = vld [vmem:[%s1560_s1] sm:$0xff]  ;;  %v17_v2 = vld [vmem:[%s1560_s1 + $0x8] sm:$0xff]  ;;  %v18_v3 = vld [vmem:[%s1560_s1 + $0x10] sm:$0xff]  ;;  %826 = vmatprep.mubr.msk.f32.mxu0 %vm1286_vm0, %v1287_v4 }
   0x2   :  { %v1315_v5 = vpack.c.bf16 %v17_v2, %v16_v1  ;;  %v19_v6 = vld [vmem:[%s1560_s1 + $0x18] sm:$0xff]  ;;  %1098 = vmatprep.subr.bf16.mxu1 %v1285_v0  ;;  %861 = vmatprep.mubr.msk.f32.mxu1 %vm1286_vm0, %v1287_v4  ;;  %v20_v8 = vld [vmem:[%s1560_s1 + $0x20] sm:$0xff]  ;;  %v21_v9 = vld [vmem:[%s1560_s1 + $0x28] sm:$0xff] }
   0x3   :  { %v1324_v7 = vpack.c.bf16 %v19_v6, %v18_v3  ;;  %v1336_v10 = vpack.c.bf16 %v21_v9, %v20_v8  ;;  %v22_v11 = vld [vmem:[%s1560_s1 + $0x30] sm:$0xff]  ;;  %v23_v12 = vld [vmem:[%s1560_s1 + $0x38] sm:$0xff]  ;;  %v24_v14 = vld [vmem:[%s1560_s1 + $0x40] sm:$0xff] }
   0x4   :  { %1076 = vmatpush3.bf16.msra.mxu0 %v1315_v5  ;;  %1100 = vmatpush3.bf16.msra.mxu1 %v1315_v5  ;;  %v1348_v13 = vpack.c.bf16 %v23_v12, %v22_v11  ;;  %v25_v15 = vld [vmem:[%s1560_s1 + $0x48] sm:$0xff]  ;;  %v26_v17 = vld [vmem:[%s1560_s1 + $0x50] sm:$0xff]  ;;  %v27_v18 = vld [vmem:[%s1560_s1 + $0x58] sm:$0xff] }
   0x5   :  { %1077 = vmatprep.subr.bf16.mxu0 %v1285_v0  ;;  %1101 = vmatprep.subr.bf16.mxu1 %v1285_v0  ;;  %v1360_v16 = vpack.c.bf16 %v25_v15, %v24_v14  ;;  %v1372_v19 = vpack.c.bf16 %v27_v18, %v26_v17  ;;  %v28_v20 = vld [vmem:[%s1560_s1 + $0x60] sm:$0xff]  ;;  %v29_v21 = vld [vmem:[%s1560_s1 + $0x68] sm:$0xff]  ;;  %v30_v23 = vld [vmem:[%s1560_s1 + $0x70] sm:$0xff] }
   0x6   :  { %v1384_v22 = vpack.c.bf16 %v29_v21, %v28_v20  ;;  %v31_v24 = vld [vmem:[%s1560_s1 + $0x78] sm:$0xff]  ;;  %v33_v26 = vld [vmem:[%s1561_s0] sm:$0xff]  ;;  %v644_v31 = vld [vmem:[%s1561_s0 + $0x8] sm:$0xff] }
   0x7   :  { %v1396_v25 = vpack.c.bf16 %v31_v24, %v30_v23  ;;  %v646_v36 = vld [vmem:[%s1561_s0 + $0x10] sm:$0xff]  ;;  %v648_v41 = vld [vmem:[%s1561_s0 + $0x18] sm:$0xff]  ;;  %v650_v46 = vld [vmem:[%s1561_s0 + $0x20] sm:$0xff] }
   0x8   :  { %1079 = vmatpush3.bf16.msra.mxu0 %v1324_v7  ;;  %1103 = vmatpush3.bf16.msra.mxu1 %v1324_v7  ;;  %v652_v51 = vld [vmem:[%s1561_s0 + $0x28] sm:$0xff]  ;;  %v654_v56 = vld [vmem:[%s1561_s0 + $0x30] sm:$0xff]  ;;  %v656_v61 = vld [vmem:[%s1561_s0 + $0x38] sm:$0xff] }
   0x9   :  { %1080 = vmatprep.subr.bf16.mxu0 %v1285_v0  ;;  %1104 = vmatprep.subr.bf16.mxu1 %v1285_v0 }
   0xc   :  { %1082 = vmatpush3.bf16.msra.mxu0 %v1336_v10  ;;  %1106 = vmatpush3.bf16.msra.mxu1 %v1336_v10 }
   0xd   :  { %1083 = vmatprep.subr.bf16.mxu0 %v1285_v0  ;;  %1107 = vmatprep.subr.bf16.mxu1 %v1285_v0 }
  0x10   :  { %1085 = vmatpush3.bf16.msra.mxu0 %v1348_v13  ;;  %1109 = vmatpush3.bf16.msra.mxu1 %v1348_v13 }
  0x11   :  { %1086 = vmatprep.subr.bf16.mxu0 %v1285_v0  ;;  %1110 = vmatprep.subr.bf16.mxu1 %v1285_v0 }
  0x14   :  { %1088 = vmatpush3.bf16.msra.mxu0 %v1360_v16  ;;  %1112 = vmatpush3.bf16.msra.mxu1 %v1360_v16 }
  0x15   :  { %1089 = vmatprep.subr.bf16.mxu0 %v1285_v0  ;;  %1113 = vmatprep.subr.bf16.mxu1 %v1285_v0 }
  0x18   :  { %1091 = vmatpush3.bf16.msra.mxu0 %v1372_v19  ;;  %1115 = vmatpush3.bf16.msra.mxu1 %v1372_v19 }
  0x19   :  { %1092 = vmatprep.subr.bf16.mxu0 %v1285_v0  ;;  %1116 = vmatprep.subr.bf16.mxu1 %v1285_v0 }
  0x1c   :  { %1094 = vmatpush3.bf16.msra.mxu0 %v1384_v22  ;;  %1118 = vmatpush3.bf16.msra.mxu1 %v1384_v22 }
  0x1d   :  { %1095 = vmatprep.subr.bf16.mxu0 %v1285_v0  ;;  %1119 = vmatprep.subr.bf16.mxu1 %v1285_v0 }
  0x20   :  { %1097 = vmatpush3.bf16.msra.mxu0 %v1396_v25  ;;  %1121 = vmatpush3.bf16.msra.mxu1 %v1396_v25 }
  0x21   :  { %1122 = vmatprep.subr.bf16.mxu0 %v1285_v0  ;;  %1146 = vmatprep.subr.bf16.mxu1 %v1285_v0 }
  0x23   :  { %827 = vmatmul.mubr.f32.vlgmr.msra.gmra.mrb[0].mxu0 %v1287_v4 }
  0x24   :  { %1124 = vmatpush3.bf16.msra.mxu0 %v1315_v5  ;;  %896 = vmatprep.mubr.msk.f32.mxu0 %vm1286_vm0, %v1287_v4 }
  0x25   :  { %1125 = vmatprep.subr.bf16.mxu0 %v1285_v0 }
  0x28   :  { %1127 = vmatpush3.bf16.msra.mxu0 %v1324_v7 }
  0x29   :  { %1128 = vmatprep.subr.bf16.mxu0 %v1285_v0 }
  0x2c   :  { %1130 = vmatpush3.bf16.msra.mxu0 %v1336_v10 }
  0x2d   :  { %1131 = vmatprep.subr.bf16.mxu0 %v1285_v0 }
  0x30   :  { %1133 = vmatpush3.bf16.msra.mxu0 %v1348_v13 }
  0x31   :  { %1134 = vmatprep.subr.bf16.mxu0 %v1285_v0 }
  0x34   :  { %1136 = vmatpush3.bf16.msra.mxu0 %v1360_v16 }
  0x35   :  { %1137 = vmatprep.subr.bf16.mxu0 %v1285_v0 }
  0x38   :  { %1139 = vmatpush3.bf16.msra.mxu0 %v1372_v19 }
  0x39   :  { %1140 = vmatprep.subr.bf16.mxu0 %v1285_v0 }
  0x3c   :  { %1142 = vmatpush3.bf16.msra.mxu0 %v1384_v22 }
  0x3d   :  { %1143 = vmatprep.subr.bf16.mxu0 %v1285_v0 }
  0x40   :  { %1145 = vmatpush3.bf16.msra.mxu0 %v1396_v25 }
  0x41   :  { %1170 = vmatprep.subr.bf16.mxu0 %v1285_v0 }
  0xf6   :  { %v100_v27 = vpop.f32.mrb[0].mxu0 }
  0xf7   :  { %v104_v28 = vadd.f32 %v100_v27, %v33_v26  ;;  %v828_v29 = vpop.f32.mrb[1].mxu0 }
  0xf9   :  { %1269 = vtanh.f32 %v104_v28 }
 0x103   :  { %v1270_v30 = vpop.eup %1269 }
 0x104   :  { %106 = vst [vmem:[%s1562_s2] sm:$0xff] %v1270_v30  ;;  %862 = vmatmul.mubr.f32.vlgmr.msra.gmra.mrb[0].mxu1 %v1270_v30 }
 0x105   :  { %1148 = vmatpush3.bf16.msra.mxu1 %v1315_v5  ;;  %931 = vmatprep.mubr.msk.f32.mxu1 %vm1286_vm0, %v1287_v4 }
 0x106   :  { %1149 = vmatprep.subr.bf16.mxu1 %v1285_v0 }
 0x109   :  { %1151 = vmatpush3.bf16.msra.mxu1 %v1324_v7 }
 0x10a   :  { %1152 = vmatprep.subr.bf16.mxu1 %v1285_v0 }
 0x10d   :  { %1154 = vmatpush3.bf16.msra.mxu1 %v1336_v10 }
 0x10e   :  { %1155 = vmatprep.subr.bf16.mxu1 %v1285_v0 }
 0x111   :  { %1157 = vmatpush3.bf16.msra.mxu1 %v1348_v13 }
 0x112   :  { %1158 = vmatprep.subr.bf16.mxu1 %v1285_v0 }
 0x115   :  { %1160 = vmatpush3.bf16.msra.mxu1 %v1360_v16 }
 0x116   :  { %1161 = vmatprep.subr.bf16.mxu1 %v1285_v0 }
 0x119   :  { %1163 = vmatpush3.bf16.msra.mxu1 %v1372_v19 }
 0x11a   :  { %1164 = vmatprep.subr.bf16.mxu1 %v1285_v0 }
 0x11d   :  { %1166 = vmatpush3.bf16.msra.mxu1 %v1384_v22 }
 0x11e   :  { %1167 = vmatprep.subr.bf16.mxu1 %v1285_v0 }
 0x121   :  { %1169 = vmatpush3.bf16.msra.mxu1 %v1396_v25 }
 0x122   :  { %1194 = vmatprep.subr.bf16.mxu1 %v1285_v0 }
 0x1d7   :  { %v175_v32 = vpop.f32.mrb[0].mxu1 }
 0x1d8   :  { %v179_v33 = vadd.f32 %v644_v31, %v175_v32  ;;  %v863_v34 = vpop.f32.mrb[1].mxu1 }
 0x1da   :  { %1271 = vtanh.f32 %v179_v33 }
 0x1e4   :  { %v1272_v35 = vpop.eup %1271 }
 0x1e5   :  { %645 = vst [vmem:[%s1562_s2 + $0x8] sm:$0xff] %v1272_v35  ;;  %897 = vmatmul.mubr.f32.vlgmr.msra.gmra.mrb[2].mxu0 %v1272_v35 }
 0x1e6   :  { %1172 = vmatpush3.bf16.msra.mxu0 %v1315_v5  ;;  %966 = vmatprep.mubr.msk.f32.mxu0 %vm1286_vm0, %v1287_v4 }
 0x1e7   :  { %1173 = vmatprep.subr.bf16.mxu0 %v1285_v0 }
 0x1ea   :  { %1175 = vmatpush3.bf16.msra.mxu0 %v1324_v7 }
 0x1eb   :  { %1176 = vmatprep.subr.bf16.mxu0 %v1285_v0 }
 0x1ee   :  { %1178 = vmatpush3.bf16.msra.mxu0 %v1336_v10 }
 0x1ef   :  { %1179 = vmatprep.subr.bf16.mxu0 %v1285_v0 }
 0x1f2   :  { %1181 = vmatpush3.bf16.msra.mxu0 %v1348_v13 }
 0x1f3   :  { %1182 = vmatprep.subr.bf16.mxu0 %v1285_v0 }
 0x1f6   :  { %1184 = vmatpush3.bf16.msra.mxu0 %v1360_v16 }
 0x1f7   :  { %1185 = vmatprep.subr.bf16.mxu0 %v1285_v0 }
 0x1fa   :  { %1187 = vmatpush3.bf16.msra.mxu0 %v1372_v19 }
 0x1fb   :  { %1188 = vmatprep.subr.bf16.mxu0 %v1285_v0 }
 0x1fe   :  { %1190 = vmatpush3.bf16.msra.mxu0 %v1384_v22 }
 0x1ff   :  { %1191 = vmatprep.subr.bf16.mxu0 %v1285_v0 }
 0x202   :  { %1193 = vmatpush3.bf16.msra.mxu0 %v1396_v25 }
 0x203   :  { %1218 = vmatprep.subr.bf16.mxu0 %v1285_v0 }
 0x2b8   :  { %v251_v37 = vpop.f32.mrb[2].mxu0 }
 0x2b9   :  { %v255_v38 = vadd.f32 %v646_v36, %v251_v37  ;;  %v898_v39 = vpop.f32.mrb[3].mxu0 }
 0x2bb   :  { %1273 = vtanh.f32 %v255_v38 }
 0x2c5   :  { %v1274_v40 = vpop.eup %1273 }
 0x2c6   :  { %647 = vst [vmem:[%s1562_s2 + $0x10] sm:$0xff] %v1274_v40  ;;  %932 = vmatmul.mubr.f32.vlgmr.msra.gmra.mrb[2].mxu1 %v1274_v40 }
 0x2c7   :  { %1196 = vmatpush3.bf16.msra.mxu1 %v1315_v5  ;;  %1001 = vmatprep.mubr.msk.f32.mxu1 %vm1286_vm0, %v1287_v4 }
 0x2c8   :  { %1197 = vmatprep.subr.bf16.mxu1 %v1285_v0 }
 0x2cb   :  { %1199 = vmatpush3.bf16.msra.mxu1 %v1324_v7 }
 0x2cc   :  { %1200 = vmatprep.subr.bf16.mxu1 %v1285_v0 }
 0x2cf   :  { %1202 = vmatpush3.bf16.msra.mxu1 %v1336_v10 }
 0x2d0   :  { %1203 = vmatprep.subr.bf16.mxu1 %v1285_v0 }
 0x2d3   :  { %1205 = vmatpush3.bf16.msra.mxu1 %v1348_v13 }
 0x2d4   :  { %1206 = vmatprep.subr.bf16.mxu1 %v1285_v0 }
 0x2d7   :  { %1208 = vmatpush3.bf16.msra.mxu1 %v1360_v16 }
 0x2d8   :  { %1209 = vmatprep.subr.bf16.mxu1 %v1285_v0 }
 0x2db   :  { %1211 = vmatpush3.bf16.msra.mxu1 %v1372_v19 }
 0x2dc   :  { %1212 = vmatprep.subr.bf16.mxu1 %v1285_v0 }
 0x2df   :  { %1214 = vmatpush3.bf16.msra.mxu1 %v1384_v22 }
 0x2e0   :  { %1215 = vmatprep.subr.bf16.mxu1 %v1285_v0 }
 0x2e3   :  { %1217 = vmatpush3.bf16.msra.mxu1 %v1396_v25 }
 0x2e4   :  { %1242 = vmatprep.subr.bf16.mxu1 %v1285_v0 }
 0x399   :  { %v327_v42 = vpop.f32.mrb[2].mxu1 }
 0x39a   :  { %v331_v43 = vadd.f32 %v648_v41, %v327_v42  ;;  %v933_v44 = vpop.f32.mrb[3].mxu1 }
 0x39c   :  { %1275 = vtanh.f32 %v331_v43 }
 0x3a6   :  { %v1276_v45 = vpop.eup %1275 }
 0x3a7   :  { %649 = vst [vmem:[%s1562_s2 + $0x18] sm:$0xff] %v1276_v45  ;;  %967 = vmatmul.mubr.f32.vlgmr.msra.gmra.mrb[4].mxu0 %v1276_v45 }
 0x3a8   :  { %1220 = vmatpush3.bf16.msra.mxu0 %v1315_v5  ;;  %1036 = vmatprep.mubr.msk.f32.mxu0 %vm1286_vm0, %v1287_v4 }
 0x3a9   :  { %1221 = vmatprep.subr.bf16.mxu0 %v1285_v0 }
 0x3ac   :  { %1223 = vmatpush3.bf16.msra.mxu0 %v1324_v7 }
 0x3ad   :  { %1224 = vmatprep.subr.bf16.mxu0 %v1285_v0 }
 0x3b0   :  { %1226 = vmatpush3.bf16.msra.mxu0 %v1336_v10 }
 0x3b1   :  { %1227 = vmatprep.subr.bf16.mxu0 %v1285_v0 }
 0x3b4   :  { %1229 = vmatpush3.bf16.msra.mxu0 %v1348_v13 }
 0x3b5   :  { %1230 = vmatprep.subr.bf16.mxu0 %v1285_v0 }
 0x3b8   :  { %1232 = vmatpush3.bf16.msra.mxu0 %v1360_v16 }
 0x3b9   :  { %1233 = vmatprep.subr.bf16.mxu0 %v1285_v0 }
 0x3bc   :  { %1235 = vmatpush3.bf16.msra.mxu0 %v1372_v19 }
 0x3bd   :  { %1236 = vmatprep.subr.bf16.mxu0 %v1285_v0 }
 0x3c0   :  { %1238 = vmatpush3.bf16.msra.mxu0 %v1384_v22 }
 0x3c1   :  { %1239 = vmatprep.subr.bf16.mxu0 %v1285_v0 }
 0x3c4   :  { %1241 = vmatpush3.bf16.msra.mxu0 %v1396_v25 }
 0x47a   :  { %v403_v47 = vpop.f32.mrb[4].mxu0 }
 0x47b   :  { %v407_v48 = vadd.f32 %v650_v46, %v403_v47  ;;  %v968_v49 = vpop.f32.mrb[5].mxu0 }
 0x47d   :  { %1277 = vtanh.f32 %v407_v48 }
 0x487   :  { %v1278_v50 = vpop.eup %1277 }
 0x488   :  { %651 = vst [vmem:[%s1562_s2 + $0x20] sm:$0xff] %v1278_v50  ;;  %1002 = vmatmul.mubr.f32.vlgmr.msra.gmra.mrb[4].mxu1 %v1278_v50 }
 0x489   :  { %1244 = vmatpush3.bf16.msra.mxu1 %v1315_v5  ;;  %1071 = vmatprep.mubr.msk.f32.mxu1 %vm1286_vm0, %v1287_v4 }
 0x48a   :  { %1245 = vmatprep.subr.bf16.mxu1 %v1285_v0 }
 0x48d   :  { %1247 = vmatpush3.bf16.msra.mxu1 %v1324_v7 }
 0x48e   :  { %1248 = vmatprep.subr.bf16.mxu1 %v1285_v0 }
 0x491   :  { %1250 = vmatpush3.bf16.msra.mxu1 %v1336_v10 }
 0x492   :  { %1251 = vmatprep.subr.bf16.mxu1 %v1285_v0 }
 0x495   :  { %1253 = vmatpush3.bf16.msra.mxu1 %v1348_v13 }
 0x496   :  { %1254 = vmatprep.subr.bf16.mxu1 %v1285_v0 }
 0x499   :  { %1256 = vmatpush3.bf16.msra.mxu1 %v1360_v16 }
 0x49a   :  { %1257 = vmatprep.subr.bf16.mxu1 %v1285_v0 }
 0x49d   :  { %1259 = vmatpush3.bf16.msra.mxu1 %v1372_v19 }
 0x49e   :  { %1260 = vmatprep.subr.bf16.mxu1 %v1285_v0 }
 0x4a1   :  { %1262 = vmatpush3.bf16.msra.mxu1 %v1384_v22 }
 0x4a2   :  { %1263 = vmatprep.subr.bf16.mxu1 %v1285_v0 }
 0x4a5   :  { %1265 = vmatpush3.bf16.msra.mxu1 %v1396_v25 }
 0x55b   :  { %v479_v52 = vpop.f32.mrb[4].mxu1 }
 0x55c   :  { %v483_v53 = vadd.f32 %v652_v51, %v479_v52  ;;  %v1003_v54 = vpop.f32.mrb[5].mxu1 }
 0x55e   :  { %1279 = vtanh.f32 %v483_v53 }
 0x568   :  { %v1280_v55 = vpop.eup %1279 }
 0x569   :  { %653 = vst [vmem:[%s1562_s2 + $0x28] sm:$0xff] %v1280_v55  ;;  %1037 = vmatmul.mubr.f32.vlgmr.msra.gmra.mrb[6].mxu0 %v1280_v55 }
 0x63c   :  { %v555_v57 = vpop.f32.mrb[6].mxu0 }
 0x63d   :  { %v559_v58 = vadd.f32 %v654_v56, %v555_v57  ;;  %v1038_v59 = vpop.f32.mrb[7].mxu0 }
 0x63f   :  { %1281 = vtanh.f32 %v559_v58 }
 0x649   :  { %v1282_v60 = vpop.eup %1281 }
 0x64a   :  { %655 = vst [vmem:[%s1562_s2 + $0x30] sm:$0xff] %v1282_v60  ;;  %1072 = vmatmul.mubr.f32.vlgmr.msra.gmra.mrb[6].mxu1 %v1282_v60 }
 0x71d   :  { %v631_v62 = vpop.f32.mrb[6].mxu1 }
 0x71e   :  { %v635_v63 = vadd.f32 %v656_v61, %v631_v62  ;;  %v1073_v0 = vpop.f32.mrb[7].mxu1 }
 0x720   :  { %1283 = vtanh.f32 %v635_v63 }
 0x72a   :  { %v1284_v1 = vpop.eup %1283 }
 0x72b   :  { %657 = vst [vmem:[%s1562_s2 + $0x38] sm:$0xff] %v1284_v1 }

</bundles_post_ra>
